<compile_context>
chip_gen: v6e
topology: v6e:2x2x1
jax: 0.10.0
libtpu: 0.0.40
codegen_flags: <defaults>
</compile_context>

<pallas_src>
import functools

import jax
import jax.numpy as jnp
from jax import lax
from jax.experimental import pallas as pl
from jax.experimental.pallas import tpu as pltpu

N_STATE = 7
H1, H2, H3, H4 = 120, 80, 50, 1
LANES = 128                     # hidden widths padded to one vreg lane width
MAX_TILE_B = 4096               # batch lanes per grid step (multiple of 128); v7x-safe
SUB_CHUNK = 512                 # in-kernel sub-tile for MXU/VPU overlap
SMALL_BATCH_XLA_THRESHOLD = 8192  # below this a fused XLA dot chain is faster than pallas_call


def _mlp_kernel(x_ref,
                w1_ref, b1_ref, w2_ref, b2_ref,
                w3_ref, b3_ref, w4_ref, b4_ref,
                o_ref, *, compute_dtype, chunk):
    """Batch-on-lanes MLP.  Activations are (features, batch_chunk)."""
    # Weights/biases are resident (constant-index blocks); load once per grid step.
    w1 = w1_ref[...]; b1 = b1_ref[...]
    w2 = w2_ref[...]; b2 = b2_ref[...]
    w3 = w3_ref[...]; b3 = b3_ref[...]
    w4 = w4_ref[...]; b4 = b4_ref[...]

    n_chunks = x_ref.shape[1] // chunk

    def body(c, carry):
        off = pl.multiple_of(c * chunk, chunk)
        x = x_ref[:, pl.ds(off, chunk)].astype(compute_dtype)          # (7, chunk)
        # fc1 + relu   (MXU in compute_dtype, accumulate/bias/relu in f32)
        h = jnp.dot(w1, x, preferred_element_type=jnp.float32) + b1    # (128, chunk)
        h = jnp.maximum(h, 0.0).astype(compute_dtype)
        # fc2 + relu
        h = jnp.dot(w2, h, preferred_element_type=jnp.float32) + b2
        h = jnp.maximum(h, 0.0).astype(compute_dtype)
        # fc3 + relu
        h = jnp.dot(w3, h, preferred_element_type=jnp.float32) + b3
        h = jnp.maximum(h, 0.0).astype(compute_dtype)
        # fc4 (no activation): lane-dense (1, chunk) store, 4 B per batch row
        y = jnp.dot(w4, h, preferred_element_type=jnp.float32) + b4    # (1, chunk)
        o_ref[:, pl.ds(off, chunk)] = y.astype(o_ref.dtype)
        return carry

    lax.fori_loop(0, n_chunks, body, 0, unroll=True)


def _pad_params(params, compute_dtype):
    """(in, out) weights -> transposed (out_pad, in_pad); bias -> (out_pad, 1) f32 column.
    Zero padding is exact: padded rows produce relu(0 + 0) = 0."""
    in_pads = [N_STATE, LANES, LANES, LANES]
    out_pads = [LANES, LANES, LANES, H4]
    padded = []
    for (w, b), ip, op in zip(params, in_pads, out_pads):
        fan_in, fan_out = w.shape
        wp = jnp.zeros((op, ip), jnp.float32).at[:fan_out, :fan_in].set(w.T)
        bp = jnp.zeros((op, 1), jnp.float32).at[:fan_out, 0].set(b)
        padded.append((wp.astype(compute_dtype), bp))   # bias stays f32
    return padded


def _round_up(n, m):
    return ((n + m - 1) // m) * m


def _pick_chunk(tile_b):
    for c in (SUB_CHUNK, 256, 128):
        if tile_b % c == 0:
            return c
    return tile_b


def net_forward_ref(x, params):
    """Pure-XLA reference / small-batch fallback (f32)."""
    x = x.reshape(-1, N_STATE).astype(jnp.float32)
    (w1, b1), (w2, b2), (w3, b3), (w4, b4) = params
    h = jnp.maximum(x @ w1 + b1, 0.0)
    h = jnp.maximum(h @ w2 + b2, 0.0)
    h = jnp.maximum(h @ w3 + b3, 0.0)
    return h @ w4 + b4


def net_forward(x, params, *, use_bf16=True, tile_b=MAX_TILE_B,
                small_batch_threshold=SMALL_BATCH_XLA_THRESHOLD):
    """x: any shape whose trailing dims flatten to n_state; returns (B, 1) float32."""
    x = x.reshape(-1, N_STATE).astype(jnp.float32)       # x.view(-1, n_state)
    B = x.shape[0]

    # Small batches: fixed pallas_call / DMA overhead dominates; use the fused XLA chain.
    if B < small_batch_threshold:
        return net_forward_ref(x, params)

    compute_dtype = jnp.bfloat16 if use_bf16 else jnp.float32
    (w1, b1), (w2, b2), (w3, b3), (w4, b4) = _pad_params(params, compute_dtype)

    # Batch-on-lanes layout: present x as (7, B); kernel output is (1, B).
    xt = x.T

    # Tile selection: multiple of 128 lanes; guarantee >= 2 grid steps for moderate B so the
    # "parallel" batch axis can feed both v7x TensorCores; cap at MAX_TILE_B for 64 MiB VMEM.
    tile_b = min(_round_up(min(tile_b, MAX_TILE_B), LANES),
                 max(LANES, _round_up(pl.cdiv(B, 2), LANES)))
    n_tiles = pl.cdiv(B, tile_b)
    b_pad = n_tiles * tile_b
    if b_pad != B:
        xt = jnp.pad(xt, ((0, 0), (0, b_pad - B)))       # padded batch cols sliced off below

    # Weights/biases: full-array blocks, constant block index -> resident in VMEM.
    resident = lambda shp: pl.BlockSpec(shp, lambda i: (0, 0))

    out = pl.pallas_call(
        functools.partial(_mlp_kernel, compute_dtype=compute_dtype,
                          chunk=_pick_chunk(tile_b)),
        out_shape=jax.ShapeDtypeStruct((1, b_pad), jnp.float32),
        grid=(n_tiles,),
        in_specs=[
            pl.BlockSpec((N_STATE, tile_b), lambda i: (0, i)),
            resident(w1.shape), resident(b1.shape),
            resident(w2.shape), resident(b2.shape),
            resident(w3.shape), resident(b3.shape),
            resident(w4.shape), resident(b4.shape),
        ],
        out_specs=pl.BlockSpec((1, tile_b), lambda i: (0, i)),
        compiler_params=pltpu.CompilerParams(
            dimension_semantics=("parallel",),            # shard batch tiles across v7x TCs
            vmem_limit_bytes=48 * 1024 * 1024,            # fits v5e/v6e (128 MiB) and v7x (64 MiB)
        ),
    )(xt, w1, b1, w2, b2, w3, b3, w4, b4)

    return out[0, :B].reshape(B, 1)


def init_params(key):
    """Deterministic init mimicking nn.Linear's U(-1/sqrt(fan_in), 1/sqrt(fan_in)).
    Weights stored (in, out) == PyTorch (out, in) transposed."""
    dims = [(N_STATE, H1), (H1, H2), (H2, H3), (H3, H4)]
    params = []
    for (fan_in, fan_out) in dims:
        key, kw, kb = jax.random.split(key, 3)
        bound = 1.0 / jnp.sqrt(float(fan_in))
        w = jax.random.uniform(kw, (fan_in, fan_out), jnp.float32, -bound, bound)
        b = jax.random.uniform(kb, (fan_out,), jnp.float32, -bound, bound)
        params.append((w, b))
    return params


if __name__ == "__main__":
    key = jax.random.PRNGKey(0)
    key, kx = jax.random.split(key)
    params = init_params(key)

    batch = 8
    x = jax.random.normal(kx, (batch, N_STATE), jnp.float32)
    ref = net_forward_ref(x, params)

    # Default path for a tiny batch: XLA fallback (exercised for shape/semantics).
    out_fallback = net_forward(x, params)
    jax.block_until_ready(out_fallback)
    assert out_fallback.shape == (batch, 1), out_fallback.shape
    assert jnp.allclose(out_fallback, ref, atol=1e-5, rtol=1e-5)

    # Force the Pallas kernel on the small batch — f32 MXU path (exact-ish).
    out_f32 = net_forward(x, params, use_bf16=False, small_batch_threshold=0)
    jax.block_until_ready(out_f32)
    assert out_f32.shape == (batch, 1), out_f32.shape
    assert jnp.allclose(out_f32, ref, atol=1e-4, rtol=1e-4), (out_f32, ref)

    # Force the Pallas kernel — bf16 MXU fast path (default dtype), looser tolerance.
    out_bf16 = net_forward(x, params, small_batch_threshold=0)
    jax.block_until_ready(out_bf16)
    assert jnp.allclose(out_bf16, ref, atol=5e-2, rtol=5e-2), (out_bf16, ref)

    # Exercise the multi-tile grid + batch-padding path (B not a multiple of the tile), f32.
    key, kx2 = jax.random.split(key)
    x_big = jax.random.normal(kx2, (2500, N_STATE), jnp.float32)
    ref_big = net_forward_ref(x_big, params)
    out_big = net_forward(x_big, params, use_bf16=False, small_batch_threshold=0)
    jax.block_until_ready(out_big)
    assert out_big.shape == (2500, 1), out_big.shape
    assert jnp.allclose(out_big, ref_big, atol=1e-4, rtol=1e-4)

    # Default (bf16) Pallas path above the XLA-fallback threshold: multi-tile + sub-chunk loop.
    key, kx3 = jax.random.split(key)
    x_huge = jax.random.normal(kx3, (9000, N_STATE), jnp.float32)
    ref_huge = net_forward_ref(x_huge, params)
    out_huge = net_forward(x_huge, params)
    jax.block_until_ready(out_huge)
    assert out_huge.shape == (9000, 1), out_huge.shape
    assert jnp.allclose(out_huge, ref_huge, atol=5e-2, rtol=5e-2)

    print("KERNEL_OK")
</pallas_src>

<mosaic_0001>
module attributes {stable_mosaic.version = 11 : i64} {
  func.func @_mlp_kernel(%arg0: i32, %arg1: memref<7x128xf32, #tpu.memory_space<vmem>>, %arg2: memref<128x7xf32, #tpu.memory_space<vmem>>, %arg3: memref<128x1xf32, #tpu.memory_space<vmem>>, %arg4: memref<128x128xf32, #tpu.memory_space<vmem>>, %arg5: memref<128x1xf32, #tpu.memory_space<vmem>>, %arg6: memref<128x128xf32, #tpu.memory_space<vmem>>, %arg7: memref<128x1xf32, #tpu.memory_space<vmem>>, %arg8: memref<1x128xf32, #tpu.memory_space<vmem>>, %arg9: memref<1x1xf32, #tpu.memory_space<vmem>>, %arg10: memref<1x128xf32, #tpu.memory_space<vmem>>) attributes {dimension_semantics = [#tpu.dimension_semantics<parallel>], iteration_bounds = array<i64: 1>, scalar_prefetch = 0 : i64, scratch_operands = 0 : i64, tpu.core_type = #tpu.core_type<tc>, window_params = [{transform_indices = @transform_0, window_bounds = array<i64: 7, 128>}, {pipeline_mode = #tpu.pipeline_mode<synchronous>, transform_indices = @transform_1, window_bounds = array<i64: 128, 7>}, {pipeline_mode = #tpu.pipeline_mode<synchronous>, transform_indices = @transform_2, window_bounds = array<i64: 128, 1>}, {pipeline_mode = #tpu.pipeline_mode<synchronous>, transform_indices = @transform_3, window_bounds = array<i64: 128, 128>}, {pipeline_mode = #tpu.pipeline_mode<synchronous>, transform_indices = @transform_4, window_bounds = array<i64: 128, 1>}, {pipeline_mode = #tpu.pipeline_mode<synchronous>, transform_indices = @transform_5, window_bounds = array<i64: 128, 128>}, {pipeline_mode = #tpu.pipeline_mode<synchronous>, transform_indices = @transform_6, window_bounds = array<i64: 128, 1>}, {pipeline_mode = #tpu.pipeline_mode<synchronous>, transform_indices = @transform_7, window_bounds = array<i64: 1, 128>}, {pipeline_mode = #tpu.pipeline_mode<synchronous>, transform_indices = @transform_8, window_bounds = array<i64: 1, 1>}, {transform_indices = @transform_9, window_bounds = array<i64: 1, 128>}]} {
    %c0 = arith.constant 0 : index
    %c0_0 = arith.constant 0 : index
    %0 = vector.load %arg2[%c0, %c0_0] : memref<128x7xf32, #tpu.memory_space<vmem>>, vector<128x7xf32>
    %c0_1 = arith.constant 0 : index
    %c0_2 = arith.constant 0 : index
    %1 = vector.load %arg3[%c0_1, %c0_2] : memref<128x1xf32, #tpu.memory_space<vmem>>, vector<128x1xf32>
    %c0_3 = arith.constant 0 : index
    %c0_4 = arith.constant 0 : index
    %2 = vector.load %arg4[%c0_3, %c0_4] : memref<128x128xf32, #tpu.memory_space<vmem>>, vector<128x128xf32>
    %c0_5 = arith.constant 0 : index
    %c0_6 = arith.constant 0 : index
    %3 = vector.load %arg5[%c0_5, %c0_6] : memref<128x1xf32, #tpu.memory_space<vmem>>, vector<128x1xf32>
    %c0_7 = arith.constant 0 : index
    %c0_8 = arith.constant 0 : index
    %4 = vector.load %arg6[%c0_7, %c0_8] : memref<128x128xf32, #tpu.memory_space<vmem>>, vector<128x128xf32>
    %c0_9 = arith.constant 0 : index
    %c0_10 = arith.constant 0 : index
    %5 = vector.load %arg7[%c0_9, %c0_10] : memref<128x1xf32, #tpu.memory_space<vmem>>, vector<128x1xf32>
    %c0_11 = arith.constant 0 : index
    %c0_12 = arith.constant 0 : index
    %6 = vector.load %arg8[%c0_11, %c0_12] : memref<1x128xf32, #tpu.memory_space<vmem>>, vector<1x128xf32>
    %c0_13 = arith.constant 0 : index
    %c0_14 = arith.constant 0 : index
    %7 = vector.load %arg9[%c0_13, %c0_14] : memref<1x1xf32, #tpu.memory_space<vmem>>, vector<1x1xf32>
    %c0_i32 = arith.constant 0 : i32
    %c128_i32 = arith.constant 128 : i32
    %8 = arith.muli %c0_i32, %c128_i32 : i32
    %9 = tpu.assume_multiple %8, 128 : i32
    %c0_15 = arith.constant 0 : index
    %10 = arith.index_cast %9 : i32 to index
    %11 = vector.load %arg1[%c0_15, %10] : memref<7x128xf32, #tpu.memory_space<vmem>>, vector<7x128xf32>
    %cst = arith.constant dense<0.000000e+00> : vector<128x128xf32>
    %12 = tpu.matmul %0, %11, %cst {dimension_numbers = #tpu.dot_dimension_numbers<[1], [0], [0], [1], [0, 0, 1, 1], [], []>} : vector<128x7xf32>, vector<7x128xf32>, vector<128x128xf32> -> vector<128x128xf32>
    %13 = vector.broadcast %1 : vector<128x1xf32> to vector<128x128xf32>
    %14 = arith.addf %12, %13 : vector<128x128xf32>
    %cst_16 = arith.constant 0.000000e+00 : f32
    %15 = vector.broadcast %cst_16 : f32 to vector<128x128xf32>
    %16 = arith.maximumf %14, %15 : vector<128x128xf32>
    %cst_17 = arith.constant dense<0.000000e+00> : vector<128x128xf32>
    %17 = tpu.matmul %2, %16, %cst_17 {dimension_numbers = #tpu.dot_dimension_numbers<[1], [0], [0], [1], [0, 0, 1, 1], [], []>} : vector<128x128xf32>, vector<128x128xf32>, vector<128x128xf32> -> vector<128x128xf32>
    %18 = vector.broadcast %3 : vector<128x1xf32> to vector<128x128xf32>
    %19 = arith.addf %17, %18 : vector<128x128xf32>
    %cst_18 = arith.constant 0.000000e+00 : f32
    %20 = vector.broadcast %cst_18 : f32 to vector<128x128xf32>
    %21 = arith.maximumf %19, %20 : vector<128x128xf32>
    %cst_19 = arith.constant dense<0.000000e+00> : vector<128x128xf32>
    %22 = tpu.matmul %4, %21, %cst_19 {dimension_numbers = #tpu.dot_dimension_numbers<[1], [0], [0], [1], [0, 0, 1, 1], [], []>} : vector<128x128xf32>, vector<128x128xf32>, vector<128x128xf32> -> vector<128x128xf32>
    %23 = vector.broadcast %5 : vector<128x1xf32> to vector<128x128xf32>
    %24 = arith.addf %22, %23 : vector<128x128xf32>
    %cst_20 = arith.constant 0.000000e+00 : f32
    %25 = vector.broadcast %cst_20 : f32 to vector<128x128xf32>
    %26 = arith.maximumf %24, %25 : vector<128x128xf32>
    %cst_21 = arith.constant dense<0.000000e+00> : vector<1x128xf32>
    %27 = tpu.matmul %6, %26, %cst_21 {dimension_numbers = #tpu.dot_dimension_numbers<[1], [0], [0], [1], [0, 0, 1, 1], [], []>} : vector<1x128xf32>, vector<128x128xf32>, vector<1x128xf32> -> vector<1x128xf32>
    %28 = vector.broadcast %7 : vector<1x1xf32> to vector<1x128xf32>
    %29 = arith.addf %27, %28 : vector<1x128xf32>
    %c0_22 = arith.constant 0 : index
    %30 = arith.index_cast %9 : i32 to index
    %31 = vector.load %arg10[%c0_22, %30] : memref<1x128xf32, #tpu.memory_space<vmem>>, vector<1x128xf32>
    tpu.vector_store %arg10[%c0_22, %30], %29 {strides = array<i32>} : memref<1x128xf32, #tpu.memory_space<vmem>>, vector<1x128xf32>,
    %c1_i32 = arith.constant 1 : i32
    return
  }
  func.func @transform_0(%arg0: i32) -> (i32, i32) {
    %c0_i32 = arith.constant 0 : i32
    %c0_i32_0 = arith.constant 0 : i32
    return %c0_i32, %arg0 : i32, i32
  }
  func.func @transform_1(%arg0: i32) -> (i32, i32) {
    %c0_i32 = arith.constant 0 : i32
    %c0_i32_0 = arith.constant 0 : i32
    %c0_i32_1 = arith.constant 0 : i32
    return %c0_i32, %c0_i32_0 : i32, i32
  }
  func.func @transform_2(%arg0: i32) -> (i32, i32) {
    %c0_i32 = arith.constant 0 : i32
    %c0_i32_0 = arith.constant 0 : i32
    %c0_i32_1 = arith.constant 0 : i32
    return %c0_i32, %c0_i32_0 : i32, i32
  }
  func.func @transform_3(%arg0: i32) -> (i32, i32) {
    %c0_i32 = arith.constant 0 : i32
    %c0_i32_0 = arith.constant 0 : i32
    %c0_i32_1 = arith.constant 0 : i32
    return %c0_i32, %c0_i32_0 : i32, i32
  }
  func.func @transform_4(%arg0: i32) -> (i32, i32) {
    %c0_i32 = arith.constant 0 : i32
    %c0_i32_0 = arith.constant 0 : i32
    %c0_i32_1 = arith.constant 0 : i32
    return %c0_i32, %c0_i32_0 : i32, i32
  }
  func.func @transform_5(%arg0: i32) -> (i32, i32) {
    %c0_i32 = arith.constant 0 : i32
    %c0_i32_0 = arith.constant 0 : i32
    %c0_i32_1 = arith.constant 0 : i32
    return %c0_i32, %c0_i32_0 : i32, i32
  }
  func.func @transform_6(%arg0: i32) -> (i32, i32) {
    %c0_i32 = arith.constant 0 : i32
    %c0_i32_0 = arith.constant 0 : i32
    %c0_i32_1 = arith.constant 0 : i32
    return %c0_i32, %c0_i32_0 : i32, i32
  }
  func.func @transform_7(%arg0: i32) -> (i32, i32) {
    %c0_i32 = arith.constant 0 : i32
    %c0_i32_0 = arith.constant 0 : i32
    %c0_i32_1 = arith.constant 0 : i32
    return %c0_i32, %c0_i32_0 : i32, i32
  }
  func.func @transform_8(%arg0: i32) -> (i32, i32) {
    %c0_i32 = arith.constant 0 : i32
    %c0_i32_0 = arith.constant 0 : i32
    %c0_i32_1 = arith.constant 0 : i32
    return %c0_i32, %c0_i32_0 : i32, i32
  }
  func.func @transform_9(%arg0: i32) -> (i32, i32) {
    %c0_i32 = arith.constant 0 : i32
    %c0_i32_0 = arith.constant 0 : i32
    return %c0_i32, %arg0 : i32, i32
  }
}

</mosaic_0001>

<bundles_post_ra>
// kernel: tpu_custom_call.1
= control target key start
LH: loop header
LB: loop body
LE: loop exit
PB: predicated region body
PF: predicated region fallthrough
CT: control target
= control target key end

     0   :  { %s1743_s0 = inlined_call_operand.vmem [shape: f32[7,128], index: 0, kind: input, shape index: {}]   ;;  %s1744_s1 = inlined_call_operand.vmem [shape: f32[128,7], index: 1, kind: input, shape index: {}]   ;;  %s1745_s2 = inlined_call_operand.vmem [shape: f32[128,1], index: 2, kind: input, shape index: {}]   ;;  %s1746_s3 = inlined_call_operand.vmem [shape: f32[128,128], index: 3, kind: input, shape index: {}]   ;;  %s1747_s4 = inlined_call_operand.vmem [shape: f32[128,1], index: 4, kind: input, shape index: {}]   ;;  %s1748_s5 = inlined_call_operand.vmem [shape: f32[128,128], index: 5, kind: input, shape index: {}]   ;;  %s1749_s6 = inlined_call_operand.vmem [shape: f32[128,1], index: 6, kind: input, shape index: {}]   ;;  %s1750_s7 = inlined_call_operand.vmem [shape: f32[1,128], index: 7, kind: input, shape index: {}]   ;;  %s1751_s8 = inlined_call_operand.<no memory space> [shape: f32[1,1], index: 8, kind: input, shape index: {}]   ;;  %s1752_s9 = inlined_call_operand.hbm [shape: f32[1,128], index: 9, kind: output, shape index: {}]  }
   0x1   :  { %v14_v0 = vstv %s1751_s8 }
   0x2   :  { %15 = vst [vmem:[#allocation2] sm:$0x1] %v14_v0 }
   0x3   :  { %v133_v1 = vld [vmem:[%s1743_s0] sm:$0x7f]  ;;  %vm263_vm0 = vcmask 1046528   ;;  %v66_v2 = vld [vmem:[%s1745_s2 + $0x78] sm:$0xff]  ;;  %v1320_v4 = vmov 0   ;;  %vm214_vm1 = vcmask 56320  }
   0x4   :  { %v35_v3 = vld [vmem:[%s1744_s1] sm:$0xff]  ;;  %1296 = vset.pattern.permute.xlu0 %v1320_v4  ;;  %1119 = vmatprep.subr.msk.mxu0 %vm263_vm0, %v133_v1  ;;  %v36_v5 = vld [vmem:[%s1744_s1 + $0x8] sm:$0xff]  ;;  %v37_v6 = vld [vmem:[%s1744_s1 + $0x10] sm:$0xff] }
   0x5   :  { %1120 = vmatpush3.msk.msra.mxu0 %vm263_vm0, %v133_v1  ;;  %211 = vperm.xlu0 %1296, %v66_v2   ;;  %v64_v7 = vld [vmem:[%s1745_s2 + $0x68] sm:$0xff]  ;;  %v65_v8 = vld [vmem:[%s1745_s2 + $0x70] sm:$0xff]  ;;  %v38_v9 = vld [vmem:[%s1744_s1 + $0x18] sm:$0xff] }
   0x6   :  { %1121 = vmatprep.mubr.msk.f32.mxu0 %vm214_vm1, %v35_v3  ;;  %1297 = vset.pattern.permute.xlu1 %v1320_v4  ;;  %v63_v10 = vld [vmem:[%s1745_s2 + $0x60] sm:$0xff]  ;;  %v62_v12 = vld [vmem:[%s1745_s2 + $0x58] sm:$0xff]  ;;  %v40_v13 = vld [vmem:[%s1744_s1 + $0x28] sm:$0xff] }
   0x7   :  { %1122 = vmatmul.mubr.msk.f32.vlgmr.msra.gmra.mxu0 %vm214_vm1, %v36_v5  ;;  %201 = vperm.xlu1 %1297, %v64_v7   ;;  %v39_v11 = vld [vmem:[%s1744_s1 + $0x20] sm:$0xff]  ;;  %v61_v14 = vld [vmem:[%s1745_s2 + $0x50] sm:$0xff]  ;;  %v60_v16 = vld [vmem:[%s1745_s2 + $0x48] sm:$0xff] }
   0x8   :  { %1124 = vmatprep.mubr.msk.f32.mxu0 %vm214_vm1, %v37_v6  ;;  %v41_v15 = vld [vmem:[%s1744_s1 + $0x30] sm:$0xff]  ;;  %v42_v17 = vld [vmem:[%s1744_s1 + $0x38] sm:$0xff]  ;;  %v59_v18 = vld [vmem:[%s1745_s2 + $0x40] sm:$0xff] }
   0x9   :  { %206 = vperm.xlu0 %1296, %v65_v8   ;;  %v43_v19 = vld [vmem:[%s1744_s1 + $0x40] sm:$0xff]  ;;  %v58_v20 = vld [vmem:[%s1745_s2 + $0x38] sm:$0xff]  ;;  %v44_v21 = vld [vmem:[%s1744_s1 + $0x48] sm:$0xff] }
   0xa   :  { %v57_v22 = vld [vmem:[%s1745_s2 + $0x30] sm:$0xff]  ;;  %v56_v24 = vld [vmem:[%s1745_s2 + $0x28] sm:$0xff]  ;;  %v46_v25 = vld [vmem:[%s1744_s1 + $0x58] sm:$0xff] }
   0xb   :  { %1125 = vmatmul.mubr.msk.f32.gmra.mxu0 %vm214_vm1, %v38_v9  ;;  %196 = vperm.xlu1 %1297, %v63_v10   ;;  %v45_v23 = vld [vmem:[%s1744_s1 + $0x50] sm:$0xff]  ;;  %v55_v26 = vld [vmem:[%s1745_s2 + $0x20] sm:$0xff] }
   0xc   :  { %1127 = vmatprep.mubr.msk.f32.mxu0 %vm214_vm1, %v39_v11  ;;  %v47_v27 = vld [vmem:[%s1744_s1 + $0x60] sm:$0xff] }
   0xd   :  { %191 = vperm.xlu0 %1296, %v62_v12  }
   0xf   :  { %1128 = vmatmul.mubr.msk.f32.gmra.mxu0 %vm214_vm1, %v40_v13  ;;  %186 = vperm.xlu1 %1297, %v61_v14  }
  0x10   :  { %1130 = vmatprep.mubr.msk.f32.mxu0 %vm214_vm1, %v41_v15 }
  0x11   :  { %181 = vperm.xlu0 %1296, %v60_v16  }
  0x13   :  { %1131 = vmatmul.mubr.msk.f32.gmra.mxu0 %vm214_vm1, %v42_v17  ;;  %176 = vperm.xlu1 %1297, %v59_v18  }
  0x14   :  { %1133 = vmatprep.mubr.msk.f32.mxu0 %vm214_vm1, %v43_v19 }
  0x15   :  { %171 = vperm.xlu0 %1296, %v58_v20  }
  0x17   :  { %1134 = vmatmul.mubr.msk.f32.gmra.mxu0 %vm214_vm1, %v44_v21  ;;  %166 = vperm.xlu1 %1297, %v57_v22  }
  0x18   :  { %1136 = vmatprep.mubr.msk.f32.mxu0 %vm214_vm1, %v45_v23 }
  0x19   :  { %161 = vperm.xlu0 %1296, %v56_v24  }
  0x1a   :  { %16 = vsyncpa [#allocation4], 0  ;;  %v54_v28 = vld [vmem:[%s1745_s2 + $0x18] sm:$0xff]  ;;  %v48_v29 = vld [vmem:[%s1744_s1 + $0x68] sm:$0xff]  ;;  %vm1322_vm2 = vmmov 0   ;;  %s1323_s24 = smov [#allocation3]  }
  0x1b   :  { %1137 = vmatmul.mubr.msk.f32.gmra.mxu0 %vm214_vm1, %v46_v25  ;;  %156 = vperm.xlu1 %1297, %v55_v26   ;;  %v53_v30 = vld [vmem:[%s1745_s2 + $0x10] sm:$0xff]  ;;  %v52_v32 = vld [vmem:[%s1745_s2 + $0x8] sm:$0xff]  ;;  %v50_v33 = vld [vmem:[%s1744_s1 + $0x78] sm:$0xff]  ;;  %s996_s25 = sshll.u32 %s1323_s24, 4  ;;  %s997_s25 = int_to_ptr.vmem [resolvable:$true] %s996_s25 }
  0x1c   :  { %1139 = vmatprep.mubr.msk.f32.mxu0 %vm214_vm1, %v47_v27  ;;  %v49_v31 = vld [vmem:[%s1744_s1 + $0x70] sm:$0xff]  ;;  %v51_v34 = vld [vmem:[%s1745_s2] sm:$0xff]  ;;  %v98_v35 = vld [vmem:[%s1747_s4 + $0x78] sm:$0xff]  ;;  %s1298_s26 = scalar_lea.vmem %s997_s25, 16  ;;  %s1302_s27 = scalar_lea.vmem %s997_s25, 32 }
  0x1d   :  { %151 = vperm.xlu0 %1296, %v54_v28   ;;  %v97_v36 = vld [vmem:[%s1747_s4 + $0x70] sm:$0xff]  ;;  %v96_v37 = vld [vmem:[%s1747_s4 + $0x68] sm:$0xff]  ;;  %v95_v38 = vld [vmem:[%s1747_s4 + $0x60] sm:$0xff]  ;;  %p1299_p0 = scmp.ne.s32.totalorder %s997_s25, %s1298_s26  ;;  %p1303_p1 = scmp.lt.s32.totalorder %s997_s25, %s997_s25 }
  0x1e   :  { %v94_v39 = vld [vmem:[%s1747_s4 + $0x58] sm:$0xff]  ;;  %v93_v40 = vld [vmem:[%s1747_s4 + $0x50] sm:$0xff]  ;;  %v92_v41 = vld [vmem:[%s1747_s4 + $0x48] sm:$0xff]  ;;  %p1304_p2 = scmp.lt.s32.totalorder %s1302_s27, %s1298_s26 }
  0x1f   :  { %1140 = vmatmul.mubr.msk.f32.gmra.mxu0 %vm214_vm1, %v48_v29  ;;  %146 = vperm.xlu1 %1297, %v53_v30   ;;  %v91_v42 = vld [vmem:[%s1747_s4 + $0x40] sm:$0xff]  ;;  %v90_v43 = vld [vmem:[%s1747_s4 + $0x38] sm:$0xff]  ;;  %v89_v44 = vld [vmem:[%s1747_s4 + $0x30] sm:$0xff] }
  0x20   :  { %1142 = vmatprep.mubr.msk.f32.mxu0 %vm214_vm1, %v49_v31  ;;  %v88_v45 = vld [vmem:[%s1747_s4 + $0x28] sm:$0xff]  ;;  %v87_v46 = vld [vmem:[%s1747_s4 + $0x20] sm:$0xff]  ;;  %v86_v47 = vld [vmem:[%s1747_s4 + $0x18] sm:$0xff]  ;;  %p1305_p3 = por %p1304_p2, %p1303_p1 }
  0x21   :  { %141 = vperm.xlu0 %1296, %v52_v32   ;;  %v85_v48 = vld [vmem:[%s1747_s4 + $0x10] sm:$0xff]  ;;  %v84_v49 = vld [vmem:[%s1747_s4 + $0x8] sm:$0xff]  ;;  %v83_v50 = vld [vmem:[%s1747_s4] sm:$0xff] }
  0x22   :  { %v130_v51 = vld [vmem:[%s1749_s6 + $0x78] sm:$0xff]  ;;  %v129_v52 = vld [vmem:[%s1749_s6 + $0x70] sm:$0xff]  ;;  %v128_v53 = vld [vmem:[%s1749_s6 + $0x68] sm:$0xff]  ;;  %p1306_p4 = pnand %p1305_p3, %p1299_p0 }
  0x23   :  { %1143 = vmatmul.mubr.msk.f32.gmra.mxu0 %vm214_vm1, %v50_v33  ;;  %136 = vperm.xlu1 %1297, %v51_v34   ;;  %v127_v54 = vld [vmem:[%s1749_s6 + $0x60] sm:$0xff]  ;;  %v126_v55 = vld [vmem:[%s1749_s6 + $0x58] sm:$0xff]  ;;  %v125_v56 = vld [vmem:[%s1749_s6 + $0x50] sm:$0xff] }
  0x24   :  { %v124_v57 = vld [vmem:[%s1749_s6 + $0x48] sm:$0xff]  ;;  %v123_v58 = vld [vmem:[%s1749_s6 + $0x40] sm:$0xff]  ;;  %v122_v59 = vld [vmem:[%s1749_s6 + $0x38] sm:$0xff] }
  0x25   :  { %505 = vperm.xlu0 %1296, %v98_v35   ;;  %v121_v60 = vld [vmem:[%s1749_s6 + $0x30] sm:$0xff]  ;;  %v120_v61 = vld [vmem:[%s1749_s6 + $0x28] sm:$0xff]  ;;  %v119_v62 = vld [vmem:[%s1749_s6 + $0x20] sm:$0xff] }
  0x26   :  { %v118_v63 = vld [vmem:[%s1749_s6 + $0x18] sm:$0xff]  ;;  %v117_v0 = vld [vmem:[%s1749_s6 + $0x10] sm:$0xff]  ;;  %v116_v1 = vld [vmem:[%s1749_s6 + $0x8] sm:$0xff] }
  0x27   :  { %500 = vperm.xlu1 %1297, %v97_v36   ;;  %v115_v2 = vld [vmem:[%s1749_s6] sm:$0xff] }
  0x28   :  { %v132_v3 = vld [vmem:[#allocation2] sm:$0x1] }
  0x29   :  { %495 = vperm.xlu0 %1296, %v96_v37   ;;  %v67_v4 = vld [vmem:[%s1746_s3] sm:$0xff] }
  0x2a   :  { %1177 = vmatprep.mubr.f32.mxu1 %v67_v4 }
  0x2b   :  { %490 = vperm.xlu1 %1297, %v95_v38  }
  0x2d   :  { %485 = vperm.xlu0 %1296, %v94_v39  }
  0x2f   :  { %480 = vperm.xlu1 %1297, %v93_v40  }
  0x31   :  { %475 = vperm.xlu0 %1296, %v92_v41  }
  0x33   :  { %470 = vperm.xlu1 %1297, %v91_v42  }
  0x35   :  { %465 = vperm.xlu0 %1296, %v90_v43  }
  0x37   :  { %460 = vperm.xlu1 %1297, %v89_v44  }
  0x39   :  { %455 = vperm.xlu0 %1296, %v88_v45  }
  0x3b   :  { %450 = vperm.xlu1 %1297, %v87_v46  }
  0x3d   :  { %445 = vperm.xlu0 %1296, %v86_v47  }
  0x3f   :  { %440 = vperm.xlu1 %1297, %v85_v48  }
  0x41   :  { %435 = vperm.xlu0 %1296, %v84_v49  }
  0x43   :  { %430 = vperm.xlu1 %1297, %v83_v50  }
  0x45   :  { %746 = vperm.xlu0 %1296, %v130_v51  }
  0x47   :  { %741 = vperm.xlu1 %1297, %v129_v52  }
  0x49   :  { %736 = vperm.xlu0 %1296, %v128_v53  }
  0x4b   :  { %731 = vperm.xlu1 %1297, %v127_v54  }
  0x4d   :  { %726 = vperm.xlu0 %1296, %v126_v55  }
  0x4f   :  { %721 = vperm.xlu1 %1297, %v125_v56  }
  0x51   :  { %716 = vperm.xlu0 %1296, %v124_v57  }
  0x53   :  { %711 = vperm.xlu1 %1297, %v123_v58  }
  0x55   :  { %706 = vperm.xlu0 %1296, %v122_v59  }
  0x57   :  { %701 = vperm.xlu1 %1297, %v121_v60  }
  0x59   :  { %696 = vperm.xlu0 %1296, %v120_v61  }
  0x5b   :  { %691 = vperm.xlu1 %1297, %v119_v62  }
  0x5d   :  { %686 = vperm.xlu0 %1296, %v118_v63  }
  0x5f   :  { %681 = vperm.xlu1 %1297, %v117_v0  }
  0x61   :  { %676 = vperm.xlu0 %1296, %v116_v1  }
  0x63   :  { %671 = vperm.xlu1 %1297, %v115_v2  }
  0x65   :  { %912 = vperm.xlu0 %1296, %v132_v3  }
  0x80   :  { %v212_v11 = vpop.permute.xlu0 %211 }
  0x82   :  { %v202_v13 = vpop.permute.xlu1 %201 }
  0x84   :  { %v207_v16 = vpop.permute.xlu0 %206 }
  0x86   :  { %v197_v18 = vpop.permute.xlu1 %196 }
  0x88   :  { %v192_v21 = vpop.permute.xlu0 %191 }
  0x8a   :  { %v187_v23 = vpop.permute.xlu1 %186 }
  0x8c   :  { %v182_v27 = vpop.permute.xlu0 %181 }
  0x8e   :  { %v177_v32 = vpop.permute.xlu1 %176 }
  0x90   :  { %v172_v37 = vpop.permute.xlu0 %171 }
  0x92   :  { %v167_v40 = vpop.permute.xlu1 %166 }
  0x94   :  { %v162_v45 = vpop.permute.xlu0 %161 }
  0x96   :  { %v157_v48 = vpop.permute.xlu1 %156 }
  0x98   :  { %v152_v53 = vpop.permute.xlu0 %151 }
  0x9a   :  { %v147_v56 = vpop.permute.xlu1 %146 }
  0x9c   :  { %v142_v61 = vpop.permute.xlu0 %141 }
  0x9e   :  { %v137_v0 = vpop.permute.xlu1 %136 }
  0xc7   :  { %v1591_v5 = vpop.f32.mrf.mxu0 }
  0xc8   :  { %v339_v62 = vadd.f32 %v1591_v5, %v142_v61  ;;  %v69_v5 = vld [vmem:[%s1746_s3 + $0x10] sm:$0xff] }
  0xc9   :  { %v1593_v6 = vpop.f32.mrf.mxu0 }
  0xca   :  { %v334_v1 = vadd.f32 %v1593_v6, %v137_v0  ;;  %v413_v3 = vmax.f32 %v339_v62, 0.0  ;;  %v70_v6 = vld [vmem:[%s1746_s3 + $0x18] sm:$0xff] }
  0xcb   :  { %v1595_v7 = vpop.f32.mrf.mxu0 }
  0xcc   :  { %v349_v57 = vadd.f32 %v1595_v7, %v152_v53  ;;  %v412_v4 = vmax.f32 %v334_v1, 0.0  ;;  %v68_v7 = vld [vmem:[%s1746_s3 + $0x8] sm:$0xff] }
  0xcd   :  { %v1597_v8 = vpop.f32.mrf.mxu0 }
  0xce   :  { %v344_v59 = vadd.f32 %v1597_v8, %v147_v56  ;;  %v415_v63 = vmax.f32 %v349_v57, 0.0  ;;  %v71_v8 = vld [vmem:[%s1746_s3 + $0x20] sm:$0xff] }
  0xcf   :  { %v1129_v9 = vpop.f32.mrf.mxu0 }
  0xd0   :  { %v359_v51 = vadd.f32 %v1129_v9, %v162_v45  ;;  %v414_v2 = vmax.f32 %v344_v59, 0.0  ;;  %v72_v9 = vld [vmem:[%s1746_s3 + $0x28] sm:$0xff] }
  0xd1   :  { %v353_v10 = vpop.f32.mrf.mxu0 }
  0xd2   :  { %v354_v54 = vadd.f32 %v353_v10, %v157_v48  ;;  %v417_v58 = vmax.f32 %v359_v51, 0.0  ;;  %v73_v10 = vld [vmem:[%s1746_s3 + $0x30] sm:$0xff] }
  0xd3   :  { %v1132_v12 = vpop.f32.mrf.mxu0 }
  0xd4   :  { %v369_v46 = vadd.f32 %v1132_v12, %v172_v37  ;;  %v416_v60 = vmax.f32 %v354_v54, 0.0  ;;  %v75_v12 = vld [vmem:[%s1746_s3 + $0x40] sm:$0xff] }
  0xd5   :  { %v363_v14 = vpop.f32.mrf.mxu0 }
  0xd6   :  { %v364_v49 = vadd.f32 %v363_v14, %v167_v40  ;;  %v419_v52 = vmax.f32 %v369_v46, 0.0  ;;  %v77_v14 = vld [vmem:[%s1746_s3 + $0x50] sm:$0xff] }
  0xd7   :  { %v1135_v15 = vpop.f32.mrf.mxu0 }
  0xd8   :  { %v379_v41 = vadd.f32 %v1135_v15, %v182_v27  ;;  %v418_v55 = vmax.f32 %v364_v49, 0.0  ;;  %v78_v15 = vld [vmem:[%s1746_s3 + $0x58] sm:$0xff]  ;;  %v506_v27 = vpop.permute.xlu0 %505 }
  0xd9   :  { %v373_v17 = vpop.f32.mrf.mxu0 }
  0xda   :  { %v374_v43 = vadd.f32 %v373_v17, %v177_v32  ;;  %v421_v47 = vmax.f32 %v379_v41, 0.0  ;;  %v80_v17 = vld [vmem:[%s1746_s3 + $0x68] sm:$0xff] }
  0xdb   :  { %v1138_v19 = vpop.f32.mrf.mxu0 }
  0xdc   :  { %v389_v35 = vadd.f32 %v1138_v19, %v192_v21  ;;  %v420_v50 = vmax.f32 %v374_v43, 0.0  ;;  %v82_v19 = vld [vmem:[%s1746_s3 + $0x78] sm:$0xff]  ;;  %v496_v32 = vpop.permute.xlu0 %495 }
  0xdd   :  { %v383_v20 = vpop.f32.mrf.mxu0 }
  0xde   :  { %v384_v38 = vadd.f32 %v383_v20, %v187_v23  ;;  %v423_v42 = vmax.f32 %v389_v35, 0.0  ;;  %v99_v20 = vld [vmem:[%s1748_s5] sm:$0xff] }
  0xdf   :  { %v1141_v22 = vpop.f32.mrf.mxu0  ;;  %1233 = vmatprep.mubr.f32.mxu0 %v99_v20 }
  0xe0   :  { %v399_v29 = vadd.f32 %v1141_v22, %v202_v13  ;;  %v422_v44 = vmax.f32 %v384_v38, 0.0  ;;  %v76_v13 = vld [vmem:[%s1746_s3 + $0x48] sm:$0xff]  ;;  %v486_v37 = vpop.permute.xlu0 %485 }
  0xe1   :  { %v393_v24 = vpop.f32.mrf.mxu0 }
  0xe2   :  { %v394_v33 = vadd.f32 %v393_v24, %v197_v18  ;;  %v425_v36 = vmax.f32 %v399_v29, 0.0  ;;  %v81_v18 = vld [vmem:[%s1746_s3 + $0x70] sm:$0xff]  ;;  %v501_v29 = vpop.permute.xlu1 %500 }
  0xe3   :  { %v1144_v25 = vpop.f32.mrf.mxu0 }
  0xe4   :  { %v409_v26 = vadd.f32 %v1144_v25, %v212_v11  ;;  %v424_v39 = vmax.f32 %v394_v33, 0.0  ;;  %v74_v11 = vld [vmem:[%s1746_s3 + $0x38] sm:$0xff]  ;;  %v476_v43 = vpop.permute.xlu0 %475 }
  0xe5   :  { %v403_v28 = vpop.f32.mrf.mxu0 }
  0xe6   :  { %v427_v30 = vmax.f32 %v409_v26, 0.0  ;;  %v404_v31 = vadd.f32 %v403_v28, %v207_v16  ;;  %v79_v16 = vld [vmem:[%s1746_s3 + $0x60] sm:$0xff] }
  0xe8   :  { %v426_v34 = vmax.f32 %v404_v31, 0.0  ;;  %1145 = vmatprep.subr.mxu1 %v427_v30  ;;  %v466_v53 = vpop.permute.xlu0 %465 }
  0xe9   :  { %1146 = vmatpush3.msra.mxu1 %v427_v30 }
  0xea   :  { %1147 = vmatprep.subr.mxu1 %v426_v34 }
  0xeb   :  { %1148 = vmatpush3.msra.mxu1 %v426_v34  ;;  %v491_v34 = vpop.permute.xlu1 %490 }
  0xec   :  { %1149 = vmatprep.subr.mxu1 %v425_v36  ;;  %v456_v61 = vpop.permute.xlu0 %455 }
  0xed   :  { %1150 = vmatpush3.msra.mxu1 %v425_v36 }
  0xee   :  { %1151 = vmatprep.subr.mxu1 %v424_v39 }
  0xef   :  { %1152 = vmatpush3.msra.mxu1 %v424_v39  ;;  %v481_v39 = vpop.permute.xlu1 %480 }
  0xf0   :  { %1153 = vmatprep.subr.mxu1 %v423_v42 }
  0xf1   :  { %1154 = vmatpush3.msra.mxu1 %v423_v42 }
  0xf2   :  { %1155 = vmatprep.subr.mxu1 %v422_v44 }
  0xf3   :  { %1156 = vmatpush3.msra.mxu1 %v422_v44  ;;  %v471_v48 = vpop.permute.xlu1 %470 }
  0xf4   :  { %1157 = vmatprep.subr.mxu1 %v421_v47 }
  0xf5   :  { %1158 = vmatpush3.msra.mxu1 %v421_v47 }
  0xf6   :  { %1159 = vmatprep.subr.mxu1 %v420_v50 }
  0xf7   :  { %1160 = vmatpush3.msra.mxu1 %v420_v50  ;;  %v461_v56 = vpop.permute.xlu1 %460 }
  0xf8   :  { %1161 = vmatprep.subr.mxu1 %v419_v52 }
  0xf9   :  { %1162 = vmatpush3.msra.mxu1 %v419_v52 }
  0xfa   :  { %1163 = vmatprep.subr.mxu1 %v418_v55 }
  0xfb   :  { %1164 = vmatpush3.msra.mxu1 %v418_v55  ;;  %v451_v0 = vpop.permute.xlu1 %450 }
  0xfc   :  { %1165 = vmatprep.subr.mxu1 %v417_v58 }
  0xfd   :  { %1166 = vmatpush3.msra.mxu1 %v417_v58 }
  0xfe   :  { %1167 = vmatprep.subr.mxu1 %v416_v60 }
  0xff   :  { %1168 = vmatpush3.msra.mxu1 %v416_v60 }
 0x100   :  { %1169 = vmatprep.subr.mxu1 %v415_v63 }
 0x101   :  { %1170 = vmatpush3.msra.mxu1 %v415_v63 }
 0x102   :  { %1171 = vmatprep.subr.mxu1 %v414_v2 }
 0x103   :  { %1172 = vmatpush3.msra.mxu1 %v414_v2 }
 0x104   :  { %1173 = vmatprep.subr.mxu1 %v413_v3 }
 0x105   :  { %1174 = vmatpush3.msra.mxu1 %v413_v3 }
 0x106   :  { %1175 = vmatprep.subr.mxu1 %v412_v4 }
 0x107   :  { %1176 = vmatpush3.msra.mxu1 %v412_v4 }
 0x108   :  { %1178 = vmatmul.mubr.f32.vlgmr.msra.gmra.mxu1 %v68_v7  ;;  %v446_v7 = vpop.permute.xlu0 %445 }
 0x109   :  { %1180 = vmatprep.mubr.f32.mxu1 %v69_v5 }
 0x10c   :  { %1181 = vmatmul.mubr.f32.gmra.mxu1 %v70_v6 }
 0x10d   :  { %1183 = vmatprep.mubr.f32.mxu1 %v71_v8  ;;  %v441_v8 = vpop.permute.xlu1 %440 }
 0x110   :  { %1184 = vmatmul.mubr.f32.gmra.mxu1 %v72_v9 }
 0x111   :  { %1186 = vmatprep.mubr.f32.mxu1 %v73_v10 }
 0x114   :  { %1187 = vmatmul.mubr.f32.gmra.mxu1 %v74_v11 }
 0x115   :  { %1189 = vmatprep.mubr.f32.mxu1 %v75_v12 }
 0x118   :  { %1190 = vmatmul.mubr.f32.gmra.mxu1 %v76_v13  ;;  %v436_v13 = vpop.permute.xlu0 %435 }
 0x119   :  { %1192 = vmatprep.mubr.f32.mxu1 %v77_v14 }
 0x11c   :  { %1193 = vmatmul.mubr.f32.gmra.mxu1 %v78_v15 }
 0x11d   :  { %1195 = vmatprep.mubr.f32.mxu1 %v79_v16  ;;  %v431_v16 = vpop.permute.xlu1 %430 }
 0x120   :  { %1196 = vmatmul.mubr.f32.gmra.mxu1 %v80_v17 }
 0x121   :  { %1198 = vmatprep.mubr.f32.mxu1 %v81_v18 }
 0x124   :  { %1199 = vmatmul.mubr.f32.gmra.mxu1 %v82_v19 }
 0x1c8   :  { %v1651_v21 = vpop.f32.mrf.mxu1 }
 0x1c9   :  { %v580_v14 = vadd.f32 %v1651_v21, %v436_v13  ;;  %v101_v21 = vld [vmem:[%s1748_s5 + $0x10] sm:$0xff] }
 0x1ca   :  { %v1653_v22 = vpop.f32.mrf.mxu1 }
 0x1cb   :  { %v575_v17 = vadd.f32 %v1653_v22, %v431_v16  ;;  %v654_v19 = vmax.f32 %v580_v14, 0.0  ;;  %v102_v22 = vld [vmem:[%s1748_s5 + $0x18] sm:$0xff] }
 0x1cc   :  { %v1655_v23 = vpop.f32.mrf.mxu1 }
 0x1cd   :  { %v590_v9 = vadd.f32 %v1655_v23, %v446_v7  ;;  %v653_v20 = vmax.f32 %v575_v17, 0.0  ;;  %v100_v23 = vld [vmem:[%s1748_s5 + $0x8] sm:$0xff] }
 0x1ce   :  { %v1657_v24 = vpop.f32.mrf.mxu1 }
 0x1cf   :  { %v585_v11 = vadd.f32 %v1657_v24, %v441_v8  ;;  %v656_v15 = vmax.f32 %v590_v9, 0.0  ;;  %v103_v24 = vld [vmem:[%s1748_s5 + $0x20] sm:$0xff] }
 0x1d0   :  { %v1185_v25 = vpop.f32.mrf.mxu1 }
 0x1d1   :  { %v600_v3 = vadd.f32 %v1185_v25, %v456_v61  ;;  %v655_v18 = vmax.f32 %v585_v11, 0.0  ;;  %v104_v25 = vld [vmem:[%s1748_s5 + $0x28] sm:$0xff] }
 0x1d2   :  { %v594_v26 = vpop.f32.mrf.mxu1 }
 0x1d3   :  { %v595_v5 = vadd.f32 %v594_v26, %v451_v0  ;;  %v658_v10 = vmax.f32 %v600_v3, 0.0  ;;  %v105_v26 = vld [vmem:[%s1748_s5 + $0x30] sm:$0xff] }
 0x1d4   :  { %v1188_v28 = vpop.f32.mrf.mxu1 }
 0x1d5   :  { %v610_v62 = vadd.f32 %v1188_v28, %v466_v53  ;;  %v657_v12 = vmax.f32 %v595_v5, 0.0  ;;  %v107_v28 = vld [vmem:[%s1748_s5 + $0x40] sm:$0xff] }
 0x1d6   :  { %v604_v30 = vpop.f32.mrf.mxu1 }
 0x1d7   :  { %v605_v1 = vadd.f32 %v604_v30, %v461_v56  ;;  %v660_v4 = vmax.f32 %v610_v62, 0.0  ;;  %v109_v30 = vld [vmem:[%s1748_s5 + $0x50] sm:$0xff] }
 0x1d8   :  { %v1191_v31 = vpop.f32.mrf.mxu1 }
 0x1d9   :  { %v620_v57 = vadd.f32 %v1191_v31, %v476_v43  ;;  %v659_v6 = vmax.f32 %v605_v1, 0.0  ;;  %v110_v31 = vld [vmem:[%s1748_s5 + $0x58] sm:$0xff]  ;;  %v747_v43 = vpop.permute.xlu0 %746 }
 0x1da   :  { %v614_v33 = vpop.f32.mrf.mxu1 }
 0x1db   :  { %v615_v59 = vadd.f32 %v614_v33, %v471_v48  ;;  %v662_v63 = vmax.f32 %v620_v57, 0.0  ;;  %v112_v33 = vld [vmem:[%s1748_s5 + $0x68] sm:$0xff] }
 0x1dc   :  { %v1194_v35 = vpop.f32.mrf.mxu1 }
 0x1dd   :  { %v630_v51 = vadd.f32 %v1194_v35, %v486_v37  ;;  %v661_v2 = vmax.f32 %v615_v59, 0.0  ;;  %v114_v35 = vld [vmem:[%s1748_s5 + $0x78] sm:$0xff]  ;;  %v737_v48 = vpop.permute.xlu0 %736 }
 0x1de   :  { %v624_v36 = vpop.f32.mrf.mxu1 }
 0x1df   :  { %v625_v54 = vadd.f32 %v624_v36, %v481_v39  ;;  %v664_v58 = vmax.f32 %v630_v51, 0.0  ;;  %v1321_v36 = vmov 0.0  }
 0x1e0   :  { %v1197_v38 = vpop.f32.mrf.mxu1  ;;  %1257 = vmatprep.subr.mxu1 %v1321_v36  ;;  %1289 = vmatprep.mubr.msk.f32.mxu1 %vm1322_vm2, %v1321_v36 }
 0x1e1   :  { %v640_v45 = vadd.f32 %v1197_v38, %v496_v32  ;;  %v663_v60 = vmax.f32 %v625_v54, 0.0  ;;  %v111_v32 = vld [vmem:[%s1748_s5 + $0x60] sm:$0xff]  ;;  %v727_v53 = vpop.permute.xlu0 %726 }
 0x1e2   :  { %v634_v40 = vpop.f32.mrf.mxu1 }
 0x1e3   :  { %v635_v49 = vadd.f32 %v634_v40, %v491_v34  ;;  %v666_v52 = vmax.f32 %v640_v45, 0.0  ;;  %v113_v34 = vld [vmem:[%s1748_s5 + $0x70] sm:$0xff]  ;;  %v742_v45 = vpop.permute.xlu1 %741 }
 0x1e4   :  { %v1200_v41 = vpop.f32.mrf.mxu1 }
 0x1e5   :  { %v650_v42 = vadd.f32 %v1200_v41, %v506_v27  ;;  %v665_v55 = vmax.f32 %v635_v49, 0.0  ;;  %v106_v27 = vld [vmem:[%s1748_s5 + $0x38] sm:$0xff]  ;;  %v717_v59 = vpop.permute.xlu0 %716 }
 0x1e6   :  { %v644_v44 = vpop.f32.mrf.mxu1 }
 0x1e7   :  { %v668_v46 = vmax.f32 %v650_v42, 0.0  ;;  %v645_v47 = vadd.f32 %v644_v44, %v501_v29  ;;  %v108_v29 = vld [vmem:[%s1748_s5 + $0x48] sm:$0xff] }
 0x1e9   :  { %v667_v50 = vmax.f32 %v645_v47, 0.0  ;;  %1201 = vmatprep.subr.mxu0 %v668_v46  ;;  %v707_v7 = vpop.permute.xlu0 %706 }
 0x1ea   :  { %1202 = vmatpush3.msra.mxu0 %v668_v46 }
 0x1eb   :  { %1203 = vmatprep.subr.mxu0 %v667_v50 }
 0x1ec   :  { %1204 = vmatpush3.msra.mxu0 %v667_v50  ;;  %v732_v50 = vpop.permute.xlu1 %731 }
 0x1ed   :  { %1205 = vmatprep.subr.mxu0 %v666_v52  ;;  %v697_v13 = vpop.permute.xlu0 %696 }
 0x1ee   :  { %1206 = vmatpush3.msra.mxu0 %v666_v52 }
 0x1ef   :  { %1207 = vmatprep.subr.mxu0 %v665_v55 }
 0x1f0   :  { %1208 = vmatpush3.msra.mxu0 %v665_v55  ;;  %v722_v55 = vpop.permute.xlu1 %721 }
 0x1f1   :  { %1209 = vmatprep.subr.mxu0 %v664_v58 }
 0x1f2   :  { %1210 = vmatpush3.msra.mxu0 %v664_v58 }
 0x1f3   :  { %1211 = vmatprep.subr.mxu0 %v663_v60 }
 0x1f4   :  { %1212 = vmatpush3.msra.mxu0 %v663_v60  ;;  %v712_v0 = vpop.permute.xlu1 %711 }
 0x1f5   :  { %1213 = vmatprep.subr.mxu0 %v662_v63 }
 0x1f6   :  { %1214 = vmatpush3.msra.mxu0 %v662_v63 }
 0x1f7   :  { %1215 = vmatprep.subr.mxu0 %v661_v2 }
 0x1f8   :  { %1216 = vmatpush3.msra.mxu0 %v661_v2  ;;  %v702_v8 = vpop.permute.xlu1 %701 }
 0x1f9   :  { %1217 = vmatprep.subr.mxu0 %v660_v4 }
 0x1fa   :  { %1218 = vmatpush3.msra.mxu0 %v660_v4 }
 0x1fb   :  { %1219 = vmatprep.subr.mxu0 %v659_v6 }
 0x1fc   :  { %1220 = vmatpush3.msra.mxu0 %v659_v6  ;;  %v692_v16 = vpop.permute.xlu1 %691 }
 0x1fd   :  { %1221 = vmatprep.subr.mxu0 %v658_v10 }
 0x1fe   :  { %1222 = vmatpush3.msra.mxu0 %v658_v10 }
 0x1ff   :  { %1223 = vmatprep.subr.mxu0 %v657_v12 }
 0x200   :  { %1224 = vmatpush3.msra.mxu0 %v657_v12 }
 0x201   :  { %1225 = vmatprep.subr.mxu0 %v656_v15 }
 0x202   :  { %1226 = vmatpush3.msra.mxu0 %v656_v15 }
 0x203   :  { %1227 = vmatprep.subr.mxu0 %v655_v18 }
 0x204   :  { %1228 = vmatpush3.msra.mxu0 %v655_v18 }
 0x205   :  { %1229 = vmatprep.subr.mxu0 %v654_v19 }
 0x206   :  { %1230 = vmatpush3.msra.mxu0 %v654_v19 }
 0x207   :  { %1231 = vmatprep.subr.mxu0 %v653_v20 }
 0x208   :  { %1232 = vmatpush3.msra.mxu0 %v653_v20 }
 0x209   :  { %1234 = vmatmul.mubr.f32.vlgmr.msra.gmra.mxu0 %v100_v23  ;;  %v687_v23 = vpop.permute.xlu0 %686 }
 0x20a   :  { %1236 = vmatprep.mubr.f32.mxu0 %v101_v21 }
 0x20d   :  { %1237 = vmatmul.mubr.f32.gmra.mxu0 %v102_v22 }
 0x20e   :  { %1239 = vmatprep.mubr.f32.mxu0 %v103_v24  ;;  %v682_v24 = vpop.permute.xlu1 %681 }
 0x211   :  { %1240 = vmatmul.mubr.f32.gmra.mxu0 %v104_v25 }
 0x212   :  { %1242 = vmatprep.mubr.f32.mxu0 %v105_v26 }
 0x215   :  { %1243 = vmatmul.mubr.f32.gmra.mxu0 %v106_v27 }
 0x216   :  { %1245 = vmatprep.mubr.f32.mxu0 %v107_v28 }
 0x219   :  { %1246 = vmatmul.mubr.f32.gmra.mxu0 %v108_v29  ;;  %v677_v29 = vpop.permute.xlu0 %676 }
 0x21a   :  { %1248 = vmatprep.mubr.f32.mxu0 %v109_v30 }
 0x21d   :  { %1249 = vmatmul.mubr.f32.gmra.mxu0 %v110_v31 }
 0x21e   :  { %1251 = vmatprep.mubr.f32.mxu0 %v111_v32  ;;  %v672_v32 = vpop.permute.xlu1 %671 }
 0x221   :  { %1252 = vmatmul.mubr.f32.gmra.mxu0 %v112_v33 }
 0x222   :  { %1254 = vmatprep.mubr.f32.mxu0 %v113_v34 }
 0x225   :  { %1255 = vmatmul.mubr.f32.gmra.mxu0 %v114_v35 }
 0x2c9   :  { %v1710_v37 = vpop.f32.mrf.mxu0 }
 0x2ca   :  { %v821_v30 = vadd.f32 %v1710_v37, %v677_v29  ;;  %v131_v37 = vld [vmem:[%s1750_s7] sm:$0x1] }
 0x2cb   :  { %v1712_v38 = vpop.f32.mrf.mxu0 }
 0x2cc   :  { %v816_v33 = vadd.f32 %v1712_v38, %v672_v32  ;;  %v895_v35 = vmax.f32 %v821_v30, 0.0 }
 0x2cd   :  { %v1714_v39 = vpop.f32.mrf.mxu0 }
 0x2ce   :  { %v831_v25 = vadd.f32 %v1714_v39, %v687_v23  ;;  %v894_v39 = vmax.f32 %v816_v33, 0.0 }
 0x2cf   :  { %v1716_v40 = vpop.f32.mrf.mxu0 }
 0x2d0   :  { %v826_v27 = vadd.f32 %v1716_v40, %v682_v24  ;;  %v897_v31 = vmax.f32 %v831_v25, 0.0  ;;  %v915_v40 = vlaneseq }
 0x2d1   :  { %v1241_v41 = vpop.f32.mrf.mxu0 }
 0x2d2   :  { %v841_v19 = vadd.f32 %v1241_v41, %v697_v13  ;;  %v896_v34 = vmax.f32 %v826_v27, 0.0  ;;  %v916_v38 = vshrl.u32 %v915_v40, 7 }
 0x2d3   :  { %v835_v42 = vpop.f32.mrf.mxu0 }
 0x2d4   :  { %v836_v21 = vadd.f32 %v835_v42, %v692_v16  ;;  %v899_v26 = vmax.f32 %v841_v19, 0.0  ;;  %v917_v41 = vsub.s32 0, %v916_v38  ;;  %v913_v42 = vpop.permute.xlu0 %912 }
 0x2d5   :  { %v1244_v44 = vpop.f32.mrf.mxu0 }
 0x2d6   :  { %v851_v14 = vadd.f32 %v1244_v44, %v707_v7  ;;  %v898_v28 = vmax.f32 %v836_v21, 0.0 }
 0x2d7   :  { %v845_v46 = vpop.f32.mrf.mxu0 }
 0x2d8   :  { %v846_v17 = vadd.f32 %v845_v46, %v702_v8  ;;  %v901_v20 = vmax.f32 %v851_v14, 0.0 }
 0x2d9   :  { %v1247_v47 = vpop.f32.mrf.mxu0 }
 0x2da   :  { %v861_v9 = vadd.f32 %v1247_v47, %v717_v59  ;;  %v900_v22 = vmax.f32 %v846_v17, 0.0 }
 0x2db   :  { %v855_v49 = vpop.f32.mrf.mxu0 }
 0x2dc   :  { %v856_v11 = vadd.f32 %v855_v49, %v712_v0  ;;  %v903_v15 = vmax.f32 %v861_v9, 0.0 }
 0x2dd   :  { %v1250_v51 = vpop.f32.mrf.mxu0 }
 0x2de   :  { %v871_v3 = vadd.f32 %v1250_v51, %v727_v53  ;;  %v902_v18 = vmax.f32 %v856_v11, 0.0 }
 0x2df   :  { %v865_v52 = vpop.f32.mrf.mxu0 }
 0x2e0   :  { %v866_v5 = vadd.f32 %v865_v52, %v722_v55  ;;  %v905_v10 = vmax.f32 %v871_v3, 0.0 }
 0x2e1   :  { %v1253_v54 = vpop.f32.mrf.mxu0 }
 0x2e2   :  { %v881_v61 = vadd.f32 %v1253_v54, %v737_v48  ;;  %v904_v12 = vmax.f32 %v866_v5, 0.0 }
 0x2e3   :  { %v875_v56 = vpop.f32.mrf.mxu0 }
 0x2e4   :  { %v876_v1 = vadd.f32 %v875_v56, %v732_v50  ;;  %v907_v4 = vmax.f32 %v881_v61, 0.0 }
 0x2e5   :  { %v1256_v57 = vpop.f32.mrf.mxu0 }
 0x2e6   :  { %v891_v58 = vadd.f32 %v1256_v57, %v747_v43  ;;  %v906_v6 = vmax.f32 %v876_v1, 0.0  ;;  %v918_v43 = vrot.slane %v913_v42, %v917_v41 }
 0x2e7   :  { %v885_v60 = vpop.f32.mrf.mxu0 }
 0x2e8   :  { %v909_v62 = vmax.f32 %v891_v58, 0.0  ;;  %v886_v63 = vadd.f32 %v885_v60, %v742_v45 }
 0x2ea   :  { %v908_v2 = vmax.f32 %v886_v63, 0.0  ;;  %1258 = vmatpush3.msra.mxu1 %v909_v62 }
 0x2eb   :  { %1259 = vmatprep.subr.mxu1 %v1321_v36 }
 0x2ec   :  { %1260 = vmatpush3.msra.mxu1 %v908_v2 }
 0x2ed   :  { %1261 = vmatprep.subr.mxu1 %v1321_v36 }
 0x2ee   :  { %1262 = vmatpush3.msra.mxu1 %v907_v4 }
 0x2ef   :  { %1263 = vmatprep.subr.mxu1 %v1321_v36 }
 0x2f0   :  { %1264 = vmatpush3.msra.mxu1 %v906_v6 }
 0x2f1   :  { %1265 = vmatprep.subr.mxu1 %v1321_v36 }
 0x2f2   :  { %1266 = vmatpush3.msra.mxu1 %v905_v10 }
 0x2f3   :  { %1267 = vmatprep.subr.mxu1 %v1321_v36 }
 0x2f4   :  { %1268 = vmatpush3.msra.mxu1 %v904_v12 }
 0x2f5   :  { %1269 = vmatprep.subr.mxu1 %v1321_v36 }
 0x2f6   :  { %1270 = vmatpush3.msra.mxu1 %v903_v15 }
 0x2f7   :  { %1271 = vmatprep.subr.mxu1 %v1321_v36 }
 0x2f8   :  { %1272 = vmatpush3.msra.mxu1 %v902_v18 }
 0x2f9   :  { %1273 = vmatprep.subr.mxu1 %v1321_v36 }
 0x2fa   :  { %1274 = vmatpush3.msra.mxu1 %v901_v20 }
 0x2fb   :  { %1275 = vmatprep.subr.mxu1 %v1321_v36 }
 0x2fc   :  { %1276 = vmatpush3.msra.mxu1 %v900_v22 }
 0x2fd   :  { %1277 = vmatprep.subr.mxu1 %v1321_v36 }
 0x2fe   :  { %1278 = vmatpush3.msra.mxu1 %v899_v26 }
 0x2ff   :  { %1279 = vmatprep.subr.mxu1 %v1321_v36 }
 0x300   :  { %1280 = vmatpush3.msra.mxu1 %v898_v28 }
 0x301   :  { %1281 = vmatprep.subr.mxu1 %v1321_v36 }
 0x302   :  { %1282 = vmatpush3.msra.mxu1 %v897_v31 }
 0x303   :  { %1283 = vmatprep.subr.mxu1 %v1321_v36 }
 0x304   :  { %1284 = vmatpush3.msra.mxu1 %v896_v34 }
 0x305   :  { %1285 = vmatprep.subr.mxu1 %v1321_v36 }
 0x306   :  { %1286 = vmatpush3.msra.mxu1 %v895_v35 }
 0x307   :  { %1287 = vmatprep.subr.mxu1 %v1321_v36 }
 0x308   :  { %1288 = vmatpush3.msra.mxu1 %v894_v39 }
 0x309   :  { %1290 = vmatmul.mubr.f32.vlgmr.msra.gmra.mxu1 %v131_v37 }
 0x3c9   :  { %v985_v44 = vpop.f32.mrf.mxu1 }
 0x3ca   :  { %v986_v45 = vadd.f32 %v985_v44, %v918_v43 }
 0x3cb   :  { %v1291_v46 = vpop.f32.mrf.mxu1 }
 0x3cc   :  { %989 = vst [vmem:[#allocation3] sm:$0x1] %v986_v45 }
 0x3cd   :  { %1309 = shalt.err (!%p1306_p4)
}
 0x3ce   :  { %999 = dma.vmem_to_hbm [thread:$0]  %s997_s25, 16, %s1752_s9, [#allocation4]  }
 0x3cf   :  { %1318 = dma.done.wait [#allocation4], 16  }
 0x3d0   :  { %1319 = vsyncadd [#allocation4], 4294967280 }
 0x3d1   :  { %1003 = vsyncpa [#allocation4], 1 }

</bundles_post_ra>
